<compile_context>
chip_gen: v7x
topology: tpu7x:2x2x1
jax: 0.10.0
libtpu: 0.0.40
codegen_flags: <defaults>
</compile_context>

<pallas_src>
import functools
import math

import jax
import jax.numpy as jnp
from jax.experimental import pallas as pl
from jax.experimental.pallas import tpu as pltpu


# ----------------------------- small helpers --------------------------------

def _round_up(x, m):
    return (x + m - 1) // m * m


def _gelu(x):
    # tanh-form GELU: transcendental lands on the EUP slot instead of a ~12-op
    # dependent VALU chain.  Differs from torch's exact-erf GELU by <~1e-3.
    return jax.nn.gelu(x, approximate=True)


# --------------------------------- kernel -----------------------------------

def _classifier_kernel(offsets, num_roles, use_context, x_ref, slab_ref, out_ref):
    R = num_roles
    BF, F32 = jnp.bfloat16, jnp.float32

    def w(name):
        # static python ints -> static, tile-aligned slice of the bf16 slab
        r0, nr, nc = offsets[name]
        return slab_ref[r0:r0 + nr, 0:nc]

    def b(name):
        # biases upcast to f32 for the add (dot results accumulate in f32)
        return w(name).astype(F32)

    x = x_ref[...].astype(BF)                                             # (B, D)

    # feature_extractor: Linear(D,D)+GELU+Dropout(id) -> Linear(D,H)+GELU+Dropout(id)
    h = _gelu(jnp.dot(x, w("w1"), preferred_element_type=F32) + b("b1"))
    h = _gelu(jnp.dot(h.astype(BF), w("w2"), preferred_element_type=F32) + b("b2"))  # (B, H)

    # fused role analyzers + confidence estimator (2 matmuls instead of 2R + 2)
    t = _gelu(jnp.dot(h.astype(BF), w("wA"), preferred_element_type=F32) + b("bA"))  # (B, R*K+K)
    s = jax.nn.sigmoid(
        jnp.dot(t.astype(BF), w("wB"), preferred_element_type=F32) + b("bB"))        # (B, R+1)
    role_scores = s[:, 0:R]                                               # (B, R) f32
    confidence = s[:, R:R + 1]                                            # (B, 1) f32

    if use_context:
        # context_integrator(cat([x, role_scores], -1)) — single fused matmul
        xr = jnp.concatenate([x, role_scores.astype(BF)], axis=-1)        # (B, D+R)
        z = _gelu(jnp.dot(xr, w("wx1"), preferred_element_type=F32) + b("bx1"))      # (B, H)
        logits = jnp.dot(z.astype(BF), w("wx2"), preferred_element_type=F32) + b("bx2")
    else:
        logits = role_scores

    # softmax over the role axis (exact normalization, f32)
    m = jnp.max(logits, axis=-1, keepdims=True)
    e = jnp.exp(logits - m)
    probs = e / jnp.sum(e, axis=-1, keepdims=True)

    # single dense store: [probs | confidence | zero pad] in one pass
    rows = probs.shape[0]
    pad = out_ref.shape[-1] - (R + 1)
    pieces = [probs, confidence]
    if pad > 0:
        pieces.append(jnp.zeros((rows, pad), F32))
    out_ref[...] = jnp.concatenate(pieces, axis=-1)


# ------------------------------ host wrapper ---------------------------------

def splat_role_classifier(splat_features, packed, context_features=None, *, batch_tile=1024):
    """Returns (role_probabilities [B, R], confidence [B, 1])."""
    # TODO(synk): the torch try/except fallback to uniform probs is host-side
    # error handling with no kernel equivalent; only the happy path is implemented.
    slab, offsets = packed["slab"], packed["offsets"]
    R, LOUT = packed["num_roles"], packed["lout"]
    B, D = splat_features.shape
    # Torch forward only checks context presence; its values are never read.
    use_context = context_features is not None

    kernel = functools.partial(_classifier_kernel, offsets, R, use_context)
    out_shape = jax.ShapeDtypeStruct((B, LOUT), jnp.float32)

    # Tiled path only when there are >= 4 full tiles (>= 2 per v7x TensorCore);
    # below that the per-grid-step overhead dominates and the gridless path is
    # strictly better.  batch_tile=1024 keeps 2x-buffered tiles far under VMEM
    # limits on every generation (including v7x's 64 MiB).
    if B % batch_tile == 0 and B // batch_tile >= 4:
        out = pl.pallas_call(
            kernel,
            out_shape=out_shape,
            grid=(B // batch_tile,),
            in_specs=[pl.BlockSpec((batch_tile, D), lambda i: (i, 0)),
                      pl.BlockSpec(slab.shape, lambda i: (0, 0))],   # slab stays resident
            out_specs=pl.BlockSpec((batch_tile, LOUT), lambda i: (i, 0)),
            compiler_params=pltpu.CompilerParams(dimension_semantics=("parallel",)),
        )(splat_features, slab)
    else:
        # Small/medium batch: everything lives in VMEM, no grid.
        vmem = pl.BlockSpec(memory_space=pltpu.MemorySpace.VMEM)
        out = pl.pallas_call(
            kernel,
            out_shape=out_shape,
            in_specs=[vmem, vmem],
            out_specs=pl.BlockSpec(memory_space=pltpu.MemorySpace.VMEM),
        )(splat_features, slab)

    return out[:, :R], out[:, R:R + 1]


# --------------------------- deterministic params ----------------------------

def _pack_slab(mats, dtype=jnp.bfloat16):
    """Pack named (rows, cols) matrices into one lane-dense slab.

    Each block starts at a tile-aligned row (16 for bf16 packing, 8 for f32)
    and column 0, so in-kernel slices are aligned static views of a single
    VMEM-resident buffer and never cross a packed-tile boundary.
    """
    align = 16 if dtype == jnp.bfloat16 else 8
    lanes = _round_up(max(a.shape[1] for a in mats.values()), 128)
    offsets, row = {}, 0
    for name, a in mats.items():
        offsets[name] = (row, a.shape[0], a.shape[1])
        row += _round_up(a.shape[0], align)
    slab = jnp.zeros((_round_up(row, align), lanes), dtype)
    for name, a in mats.items():
        r0, nr, nc = offsets[name]
        slab = slab.at[r0:r0 + nr, :nc].set(a.astype(dtype))
    return slab, offsets


def pack_params(key, model_dim, num_roles):
    D, R = model_dim, num_roles
    H, K = D // 2, D // 4
    keys = iter(jax.random.split(key, 16 + 4 * R))

    def lin(fan_in, fan_out):
        w = jax.random.normal(next(keys), (fan_in, fan_out), jnp.float32) / math.sqrt(fan_in)
        b = 0.01 * jax.random.normal(next(keys), (1, fan_out), jnp.float32)
        return w, b

    # feature_extractor
    w1, b1 = lin(D, D)
    w2, b2 = lin(D, H)

    # role_analyzers (R of them) + confidence_estimator, fused
    wa1_l, ba1_l, wa2_l, ba2_l = [], [], [], []
    for _ in range(R):
        wr1, br1 = lin(H, K)
        wr2, br2 = lin(K, 1)
        wa1_l.append(wr1); ba1_l.append(br1); wa2_l.append(wr2); ba2_l.append(br2)
    wc1, bc1 = lin(H, K)
    wc2, bc2 = lin(K, 1)

    wA = jnp.concatenate(wa1_l + [wc1], axis=1)            # (H, R*K + K)
    bA = jnp.concatenate(ba1_l + [bc1], axis=1)            # (1, R*K + K)
    # Block-diagonal role second layers + confidence column (exactly equivalent
    # because the off-block entries are exactly zero).
    wB = jnp.zeros((R * K + K, R + 1), jnp.float32)
    for r in range(R):
        wB = wB.at[r * K:(r + 1) * K, r].set(wa2_l[r][:, 0])
    wB = wB.at[R * K:, R].set(wc2[:, 0])                   # (R*K + K, R + 1)
    bB = jnp.concatenate(ba2_l + [bc2], axis=1)            # (1, R + 1)

    # context_integrator: Linear(D+R, H) kept whole (single fused matmul), then Linear(H, R)
    wx1, bx1 = lin(D + R, H)
    wx2, bx2 = lin(H, R)

    mats = {
        "w1": w1, "b1": b1, "w2": w2, "b2": b2,
        "wA": wA, "bA": bA, "wB": wB, "bB": bB,
        "wx1": wx1, "bx1": bx1, "wx2": wx2, "bx2": bx2,
    }
    slab, offsets = _pack_slab(mats, dtype=jnp.bfloat16)
    return {
        "slab": slab,
        "offsets": offsets,
        "num_roles": R,
        "lout": _round_up(R + 1, 8),   # probs (R) + confidence (1), sublane-padded
    }


# ----------------------------------- main ------------------------------------

if __name__ == "__main__":
    model_dim, num_roles, batch = 32, 4, 8

    key = jax.random.PRNGKey(0)
    pkey, xkey, ckey = jax.random.split(key, 3)
    packed = pack_params(pkey, model_dim, num_roles)

    splat_features = jax.random.normal(xkey, (batch, model_dim), jnp.float32)
    context_features = jax.random.normal(ckey, (batch, model_dim), jnp.float32)

    # Path 1: no context -> softmax over per-role sigmoid scores.
    probs, conf = splat_role_classifier(splat_features, packed, context_features=None)
    # Path 2: with context -> context_integrator(cat([splat_features, role_scores])).
    probs_c, conf_c = splat_role_classifier(splat_features, packed,
                                            context_features=context_features)
    # Path 3: large batch (4 tiles of 1024) -> batch-tiled "parallel" grid path.
    big_batch = 4096
    xb = jax.random.normal(xkey, (big_batch, model_dim), jnp.float32)
    probs_b, conf_b = splat_role_classifier(xb, packed)

    jax.block_until_ready((probs, conf, probs_c, conf_c, probs_b, conf_b))

    assert probs.shape == (batch, num_roles) and conf.shape == (batch, 1)
    assert probs_c.shape == (batch, num_roles) and conf_c.shape == (batch, 1)
    assert probs_b.shape == (big_batch, num_roles) and conf_b.shape == (big_batch, 1)
    for p in (probs, probs_c, probs_b):
        assert bool(jnp.all(jnp.isfinite(p)))
        # exact f32 softmax normalization
        assert bool(jnp.allclose(jnp.sum(p, axis=-1), 1.0, atol=1e-5))
    for c in (conf, conf_c, conf_b):
        assert bool(jnp.all(jnp.isfinite(c)))
        assert bool(jnp.all((c > 0.0) & (c < 1.0)))

    print("KERNEL_OK")
</pallas_src>

<mosaic_0001>
module attributes {stable_mosaic.version = 11 : i64} {
  func.func @_classifier_kernel(%arg0: memref<8x32xf32, #tpu.memory_space<vmem>>, %arg1: memref<288x128xbf16, #tpu.memory_space<vmem>>, %arg2: memref<8x8xf32, #tpu.memory_space<vmem>>) attributes {dimension_semantics = [], scalar_prefetch = 0 : i64, scratch_operands = 0 : i64, tpu.core_type = #tpu.core_type<tc>} {
    %c0 = arith.constant 0 : index
    %c0_0 = arith.constant 0 : index
    %0 = vector.load %arg0[%c0, %c0_0] : memref<8x32xf32, #tpu.memory_space<vmem>>, vector<8x32xf32>
    %1 = arith.truncf %0 : vector<8x32xf32> to vector<8x32xbf16>
    %c0_1 = arith.constant 0 : index
    %c0_2 = arith.constant 0 : index
    %2 = vector.load %arg1[%c0_1, %c0_2] : memref<288x128xbf16, #tpu.memory_space<vmem>>, vector<32x32xbf16>
    %cst = arith.constant dense<0.000000e+00> : vector<8x32xf32>
    %3 = tpu.matmul %1, %2, %cst {dimension_numbers = #tpu.dot_dimension_numbers<[1], [0], [0], [1], [0, 0, 1, 1], [], []>} : vector<8x32xbf16>, vector<32x32xbf16>, vector<8x32xf32> -> vector<8x32xf32>
    %c32 = arith.constant 32 : index
    %c0_3 = arith.constant 0 : index
    %4 = vector.load %arg1[%c32, %c0_3] : memref<288x128xbf16, #tpu.memory_space<vmem>>, vector<1x32xbf16>
    %5 = arith.extf %4 : vector<1x32xbf16> to vector<1x32xf32>
    %6 = vector.broadcast %5 : vector<1x32xf32> to vector<8x32xf32>
    %7 = arith.addf %3, %6 : vector<8x32xf32>
    %8 = arith.mulf %7, %7 : vector<8x32xf32>
    %9 = arith.mulf %7, %8 : vector<8x32xf32>
    %cst_4 = arith.constant 4.471500e-02 : f32
    %10 = vector.broadcast %cst_4 : f32 to vector<8x32xf32>
    %11 = arith.mulf %10, %9 : vector<8x32xf32>
    %12 = arith.addf %7, %11 : vector<8x32xf32>
    %cst_5 = arith.constant 0.797884583 : f32
    %13 = vector.broadcast %cst_5 : f32 to vector<8x32xf32>
    %14 = arith.mulf %13, %12 : vector<8x32xf32>
    %15 = math.tanh %14 : vector<8x32xf32>
    %cst_6 = arith.constant 1.000000e+00 : f32
    %16 = vector.broadcast %cst_6 : f32 to vector<8x32xf32>
    %17 = arith.addf %16, %15 : vector<8x32xf32>
    %cst_7 = arith.constant 5.000000e-01 : f32
    %18 = vector.broadcast %cst_7 : f32 to vector<8x32xf32>
    %19 = arith.mulf %18, %17 : vector<8x32xf32>
    %20 = arith.mulf %7, %19 : vector<8x32xf32>
    %21 = arith.truncf %20 : vector<8x32xf32> to vector<8x32xbf16>
    %c48 = arith.constant 48 : index
    %c0_8 = arith.constant 0 : index
    %22 = vector.load %arg1[%c48, %c0_8] : memref<288x128xbf16, #tpu.memory_space<vmem>>, vector<32x16xbf16>
    %cst_9 = arith.constant dense<0.000000e+00> : vector<8x16xf32>
    %23 = tpu.matmul %21, %22, %cst_9 {dimension_numbers = #tpu.dot_dimension_numbers<[1], [0], [0], [1], [0, 0, 1, 1], [], []>} : vector<8x32xbf16>, vector<32x16xbf16>, vector<8x16xf32> -> vector<8x16xf32>
    %c80 = arith.constant 80 : index
    %c0_10 = arith.constant 0 : index
    %24 = vector.load %arg1[%c80, %c0_10] : memref<288x128xbf16, #tpu.memory_space<vmem>>, vector<1x16xbf16>
    %25 = arith.extf %24 : vector<1x16xbf16> to vector<1x16xf32>
    %26 = vector.broadcast %25 : vector<1x16xf32> to vector<8x16xf32>
    %27 = arith.addf %23, %26 : vector<8x16xf32>
    %28 = arith.mulf %27, %27 : vector<8x16xf32>
    %29 = arith.mulf %27, %28 : vector<8x16xf32>
    %cst_11 = arith.constant 4.471500e-02 : f32
    %30 = vector.broadcast %cst_11 : f32 to vector<8x16xf32>
    %31 = arith.mulf %30, %29 : vector<8x16xf32>
    %32 = arith.addf %27, %31 : vector<8x16xf32>
    %cst_12 = arith.constant 0.797884583 : f32
    %33 = vector.broadcast %cst_12 : f32 to vector<8x16xf32>
    %34 = arith.mulf %33, %32 : vector<8x16xf32>
    %35 = math.tanh %34 : vector<8x16xf32>
    %cst_13 = arith.constant 1.000000e+00 : f32
    %36 = vector.broadcast %cst_13 : f32 to vector<8x16xf32>
    %37 = arith.addf %36, %35 : vector<8x16xf32>
    %cst_14 = arith.constant 5.000000e-01 : f32
    %38 = vector.broadcast %cst_14 : f32 to vector<8x16xf32>
    %39 = arith.mulf %38, %37 : vector<8x16xf32>
    %40 = arith.mulf %27, %39 : vector<8x16xf32>
    %41 = arith.truncf %40 : vector<8x16xf32> to vector<8x16xbf16>
    %c96 = arith.constant 96 : index
    %c0_15 = arith.constant 0 : index
    %42 = vector.load %arg1[%c96, %c0_15] : memref<288x128xbf16, #tpu.memory_space<vmem>>, vector<16x40xbf16>
    %cst_16 = arith.constant dense<0.000000e+00> : vector<8x40xf32>
    %43 = tpu.matmul %41, %42, %cst_16 {dimension_numbers = #tpu.dot_dimension_numbers<[1], [0], [0], [1], [0, 0, 1, 1], [], []>} : vector<8x16xbf16>, vector<16x40xbf16>, vector<8x40xf32> -> vector<8x40xf32>
    %c112 = arith.constant 112 : index
    %c0_17 = arith.constant 0 : index
    %44 = vector.load %arg1[%c112, %c0_17] : memref<288x128xbf16, #tpu.memory_space<vmem>>, vector<1x40xbf16>
    %45 = arith.extf %44 : vector<1x40xbf16> to vector<1x40xf32>
    %46 = vector.broadcast %45 : vector<1x40xf32> to vector<8x40xf32>
    %47 = arith.addf %43, %46 : vector<8x40xf32>
    %48 = arith.mulf %47, %47 : vector<8x40xf32>
    %49 = arith.mulf %47, %48 : vector<8x40xf32>
    %cst_18 = arith.constant 4.471500e-02 : f32
    %50 = vector.broadcast %cst_18 : f32 to vector<8x40xf32>
    %51 = arith.mulf %50, %49 : vector<8x40xf32>
    %52 = arith.addf %47, %51 : vector<8x40xf32>
    %cst_19 = arith.constant 0.797884583 : f32
    %53 = vector.broadcast %cst_19 : f32 to vector<8x40xf32>
    %54 = arith.mulf %53, %52 : vector<8x40xf32>
    %55 = math.tanh %54 : vector<8x40xf32>
    %cst_20 = arith.constant 1.000000e+00 : f32
    %56 = vector.broadcast %cst_20 : f32 to vector<8x40xf32>
    %57 = arith.addf %56, %55 : vector<8x40xf32>
    %cst_21 = arith.constant 5.000000e-01 : f32
    %58 = vector.broadcast %cst_21 : f32 to vector<8x40xf32>
    %59 = arith.mulf %58, %57 : vector<8x40xf32>
    %60 = arith.mulf %47, %59 : vector<8x40xf32>
    %61 = arith.truncf %60 : vector<8x40xf32> to vector<8x40xbf16>
    %c128 = arith.constant 128 : index
    %c0_22 = arith.constant 0 : index
    %62 = vector.load %arg1[%c128, %c0_22] : memref<288x128xbf16, #tpu.memory_space<vmem>>, vector<40x5xbf16>
    %cst_23 = arith.constant dense<0.000000e+00> : vector<8x5xf32>
    %63 = tpu.matmul %61, %62, %cst_23 {dimension_numbers = #tpu.dot_dimension_numbers<[1], [0], [0], [1], [0, 0, 1, 1], [], []>} : vector<8x40xbf16>, vector<40x5xbf16>, vector<8x5xf32> -> vector<8x5xf32>
    %c176 = arith.constant 176 : index
    %c0_24 = arith.constant 0 : index
    %64 = vector.load %arg1[%c176, %c0_24] : memref<288x128xbf16, #tpu.memory_space<vmem>>, vector<1x5xbf16>
    %65 = arith.extf %64 : vector<1x5xbf16> to vector<1x5xf32>
    %66 = vector.broadcast %65 : vector<1x5xf32> to vector<8x5xf32>
    %67 = arith.addf %63, %66 : vector<8x5xf32>
    %68 = arith.negf %67 : vector<8x5xf32>
    %69 = math.exp %68 : vector<8x5xf32>
    %cst_25 = arith.constant 1.000000e+00 : f32
    %70 = vector.broadcast %cst_25 : f32 to vector<8x5xf32>
    %71 = arith.addf %70, %69 : vector<8x5xf32>
    %72 = arith.divf %70, %71 : vector<8x5xf32>
    %73 = vector.extract_strided_slice %72 {offsets = [0, 0], sizes = [8, 4], strides = [1, 1]} : vector<8x5xf32> to vector<8x4xf32>
    %74 = vector.extract_strided_slice %72 {offsets = [0, 4], sizes = [8, 1], strides = [1, 1]} : vector<8x5xf32> to vector<8x1xf32>
    %cst_26 = arith.constant dense<0xFF800000> : vector<8xf32>
    %75 = vector.multi_reduction <maximumf>, %73, %cst_26 [1] : vector<8x4xf32> to vector<8xf32>
    %76 = vector.shape_cast %75 : vector<8xf32> to vector<8x1xf32>
    %77 = vector.broadcast %76 : vector<8x1xf32> to vector<8x4xf32>
    %78 = arith.subf %73, %77 : vector<8x4xf32>
    %79 = math.exp %78 : vector<8x4xf32>
    %cst_27 = arith.constant dense<0.000000e+00> : vector<8xf32>
    %80 = vector.multi_reduction <add>, %79, %cst_27 [1] : vector<8x4xf32> to vector<8xf32>
    %81 = vector.shape_cast %80 : vector<8xf32> to vector<8x1xf32>
    %82 = vector.broadcast %81 : vector<8x1xf32> to vector<8x4xf32>
    %83 = arith.divf %79, %82 : vector<8x4xf32>
    %cst_28 = arith.constant 0.000000e+00 : f32
    %84 = vector.broadcast %cst_28 : f32 to vector<8x3xf32>
    %85 = tpu.concatenate %83, %74, %84 in 1 : vector<8x4xf32>, vector<8x1xf32>, vector<8x3xf32> -> vector<8x8xf32>
    %c0_29 = arith.constant 0 : index
    %c0_30 = arith.constant 0 : index
    %86 = vector.load %arg2[%c0_29, %c0_30] : memref<8x8xf32, #tpu.memory_space<vmem>>, vector<8x8xf32>
    tpu.vector_store %arg2[%c0_29, %c0_30], %85 {strides = array<i32>} : memref<8x8xf32, #tpu.memory_space<vmem>>, vector<8x8xf32>,
    return
  }
}

</mosaic_0001>

<bundles_post_ra>
// kernel: tpu_custom_call.1
= control target key start
LH: loop header
LB: loop body
LE: loop exit
PB: predicated region body
PF: predicated region fallthrough
CT: control target
= control target key end

     0   :  { %7 = vsyncpa [#allocation3], 0  ;;  %s623_s0 = inlined_call_operand.hbm [shape: f32[8,32], index: 0, kind: input, shape index: {}]   ;;  %s624_s1 = inlined_call_operand.hbm [shape: bf16[288,128], index: 1, kind: input, shape index: {}]   ;;  %s625_s2 = inlined_call_operand.hbm [shape: f32[8,8], index: 2, kind: output, shape index: {}]  }
   0x1   :  { %8 = vsyncpa [#allocation6], 0 }
   0x2   :  { %9 = vsyncpa [#allocation4], 0  ;;  %s531_s9 = smov [#allocation2]   ;;  %s532_s11 = smov [#allocation5]  }
   0x3   :  { %s16_s10 = sshll.u32 %s531_s9, 4  ;;  %s25_s12 = sshll.u32 %s532_s11, 4  ;;  %s17_s10 = int_to_ptr.vmem [resolvable:$true] %s16_s10  ;;  %s553_s12 = int_to_ptr.vmem [resolvable:$true] %s25_s12 }
   0x4   :  { %s459_s15 = scalar_lea.hbm %s623_s0, 128 }
   0x5   :  { %p460_p0 = scmp.ne.s32.totalorder %s623_s0, %s459_s15  ;;  %p463_p1 = scmp.lt.u32.totalorder %s459_s15, %s623_s0 }
   0x7   :  { %p465_p2 = pnand %p463_p1, %p460_p0 }
   0x9   :  { %468 = shalt.err (!%p465_p2)
}
   0xa   :  { %s469_s20 = scalar_lea.vmem %s17_s10, 128  ;;  %p474_p4 = scmp.lt.s32.totalorder %s17_s10, %s17_s10 }
   0xb   :  { %p470_p3 = scmp.ne.s32.totalorder %s17_s10, %s469_s20  ;;  %p475_p5 = scmp.lt.s32.totalorder %s469_s20, %s469_s20 }
   0xd   :  { %p476_p6 = por %p475_p5, %p474_p4 }
   0xf   :  { %p477_p7 = pnand %p476_p6, %p470_p3 }
  0x11   :  { %480 = shalt.err (!%p477_p7)
}
  0x12   :  { %19 = dma.hbm_to_vmem [thread:$0]  %s623_s0, 128, %s17_s10, [#allocation3]  }
  0x13   :  { %s481_s25 = scalar_lea.hbm %s624_s1, 2304 }
  0x14   :  { %p482_p8 = scmp.ne.s32.totalorder %s624_s1, %s481_s25  ;;  %p485_p9 = scmp.lt.u32.totalorder %s481_s25, %s624_s1 }
  0x16   :  { %p487_p10 = pnand %p485_p9, %p482_p8 }
  0x18   :  { %490 = shalt.err (!%p487_p10)
}
  0x19   :  { %s491_s30 = scalar_lea.vmem %s553_s12, 2304  ;;  %p496_p12 = scmp.lt.s32.totalorder %s553_s12, %s553_s12 }
  0x1a   :  { %p492_p11 = scmp.ne.s32.totalorder %s553_s12, %s491_s30  ;;  %p497_p13 = scmp.lt.s32.totalorder %s491_s30, %s491_s30 }
  0x1c   :  { %p498_p0 = por %p497_p13, %p496_p12 }
  0x1e   :  { %p499_p1 = pnand %p498_p0, %p492_p11 }
  0x20   :  { %502 = shalt.err (!%p499_p1)
}
  0x21   :  { %s533_s0 = smov 64   ;;  %s534_s3 = smov 4  }
  0x22   :  { %31 = dma.hbm_to_vmem [thread:$0]  %s624_s1, 2304, %s553_s12, [#allocation6], %s533_s0, %s533_s0, %s534_s3  }
  0x23   :  { %525 = dma.done.wait [#allocation3], 128  }
  0x24   :  { %526 = vsyncadd [#allocation3], 4294967168 }
  0x25   :  { %527 = dma.done.wait [#allocation6], 2304  }
  0x26   :  { %528 = vsyncadd [#allocation6], 4294964992  ;;  %v535_v0 = vmov 0.0   ;;  %vm536_vm0 = vmmov 0   ;;  %v437_v1 = vld [vmem:[#allocation5] sm:$0xff]   ;;  %v438_v2 = vld [vmem:[#allocation5 + $0x8] sm:$0xff]   ;;  %v47_v7 = vlaneseq }
  0x27   :  { %398 = vmatprep.subr.bf16.mxu0 %v535_v0  ;;  %402 = vmatprep.mubr.msk.bf16.mxu0 %vm536_vm0, %v535_v0  ;;  %v39_v3 = vld [vmem:[#allocation2] sm:$0xff]  ;;  %vm63_vm1 = vcmask 261120   ;;  %v440_v6 = vld [vmem:[#allocation5 + $0x20] sm:$0xff]   ;;  %v45_v9 = vld [vmem:[#allocation5 + $0x10] sm:$0x1]  ;;  %vm206_vm2 = vcmask 130048  }
  0x28   :  { %406 = vmatprep.subr.bf16.mxu1 %v535_v0  ;;  %410 = vmatprep.mubr.msk.bf16.mxu1 %vm536_vm0, %v535_v0  ;;  %v40_v4 = vpack.c.bf16 %v39_v3, %v39_v3  ;;  %v439_v5 = vld [vmem:[#allocation5 + $0x18] sm:$0xff]   ;;  %v48_v8 = vshrl.u32 %v47_v7, 7  ;;  %v46_v10 = vunpack.c.l.bf16 %v45_v9  ;;  %v441_v28 = vld [vmem:[#allocation5 + $0x30] sm:$0xff]   ;;  %v121_v29 = vld [vmem:[#allocation5 + $0x28] sm:$0x1]  ;;  %vm290_vm3 = vcmask 1043456  }
  0x29   :  { %399 = vmatpush3.bf16.msra.mxu0 %v437_v1  ;;  %407 = vmatpush3.bf16.msra.mxu1 %v439_v5  ;;  %v122_v30 = vunpack.c.l.bf16 %v121_v29  ;;  %v442_v47 = vld [vmem:[#allocation5 + $0x40] sm:$0xff]   ;;  %v443_v48 = vld [vmem:[#allocation5 + $0x48] sm:$0xff]   ;;  %v444_v49 = vld [vmem:[#allocation5 + $0x50] ss:$0 sps:$4 sm:$0xff]   ;;  %vm286_vm4 = vcmask 326656   ;;  %vm340_vm5 = vcmask 31744  }
  0x2a   :  { %400 = vmatprep.subr.bf16.mxu0 %v535_v0  ;;  %408 = vmatprep.subr.bf16.mxu1 %v535_v0  ;;  %v597_v11 = vsub.s32 0, %v48_v8  ;;  %v292_v50 = vsel %vm290_vm3, %v444_v49, 0  ;;  %v194_v51 = vld [vmem:[#allocation5 + $0x38] sm:$0x1]  ;;  %s537_s1 = smov [#allocation7]   ;;  %vm353_vm6 = vcmask 39936  }
  0x2b   :  { %v195_v52 = vunpack.c.l.bf16 %v194_v51  ;;  %v265_v5 = vld [vmem:[#allocation5 + $0x58] sm:$0x1]  ;;  %s363_s6 = sshll.u32 %s537_s1, 4  ;;  %vm355_vm7 = vcmask 64512   ;;  %s364_s6 = int_to_ptr.vmem [resolvable:$true] %s363_s6 }
  0x2c   :  { %v50_v12 = vrot.slane %v46_v10, %v597_v11  ;;  %v126_v31 = vrot.slane %v122_v30, %v597_v11  ;;  %s503_s7 = scalar_lea.vmem %s364_s6, 128  ;;  %p508_p3 = scmp.lt.s32.totalorder %s364_s6, %s364_s6 }
  0x2d   :  { %401 = vmatpush3.bf16.msra.mxu0 %v438_v2  ;;  %409 = vmatpush3.bf16.msra.mxu1 %v440_v6  ;;  %v199_v53 = vrot.slane %v195_v52, %v597_v11  ;;  %v266_v6 = vunpack.c.l.bf16 %v265_v5  ;;  %p504_p2 = scmp.ne.s32.totalorder %s364_s6, %s503_s7  ;;  %p509_p4 = scmp.lt.s32.totalorder %s503_s7, %s503_s7 }
  0x2e   :  { %414 = vmatprep.subr.bf16.mxu0 %v535_v0  ;;  %420 = vmatprep.subr.bf16.mxu1 %v535_v0 }
  0x2f   :  { %v270_v7 = vrot.slane %v266_v6, %v597_v11  ;;  %p510_p5 = por %p509_p4, %p508_p3 }
  0x30   :  { %403 = vmatmul.mubr.msk.bf16.vlgmr.msra.gmra.mrb[0].mxu0 %vm63_vm1, %v40_v4 }
  0x31   :  { %416 = vmatprep.mubr.msk.bf16.mxu0 %vm536_vm0, %v535_v0  ;;  %415 = vmatpush3.bf16.msra.mxu0 %v441_v28  ;;  %p511_p6 = pnand %p510_p5, %p504_p2 }
 0x103   :  { %v101_v13 = vpop.f32.mrb[0].mxu0 }
 0x104   :  { %v102_v14 = vadd.f32 %v101_v13, %v50_v12  ;;  %v404_v15 = vpop.f32.mrb[1].mxu0 }
 0x105   :  { %v104_v16 = vpop.f32.mrb[2].mxu0 }
 0x106   :  { %v107_v17 = vmul.f32 %v102_v14, %v102_v14  ;;  %v405_v18 = vpop.f32.mrb[3].mxu0 }
 0x108   :  { %v108_v19 = vmul.f32 %v107_v17, %v102_v14 }
 0x10a   :  { %v109_v20 = vmul.f32 0.044715, %v108_v19 }
 0x10c   :  { %v110_v21 = vadd.f32 %v109_v20, %v102_v14 }
 0x10e   :  { %v111_v22 = vmul.f32 0.7978846, %v110_v21 }
 0x110   :  { %445 = vtanh.f32 %v111_v22 }
 0x11a   :  { %v446_v23 = vpop.eup %445 }
 0x11b   :  { %v113_v24 = vadd.f32 1.0, %v446_v23 }
 0x11d   :  { %v114_v25 = vmul.f32 0.5, %v113_v24 }
 0x11f   :  { %v115_v26 = vmul.f32 %v114_v25, %v102_v14 }
 0x121   :  { %v116_v27 = vpack.c.bf16 %v115_v26, %v115_v26 }
 0x123   :  { %411 = vmatmul.mubr.msk.bf16.vlgmr.msra.gmra.mrb[0].mxu1 %vm63_vm1, %v116_v27 }
 0x124   :  { %426 = vmatprep.mubr.msk.bf16.mxu1 %vm536_vm0, %v535_v0  ;;  %421 = vmatpush3.bf16.msra.mxu1 %v442_v47 }
 0x125   :  { %422 = vmatprep.subr.bf16.mxu1 %v535_v0 }
 0x128   :  { %423 = vmatpush3.bf16.msra.mxu1 %v443_v48 }
 0x129   :  { %424 = vmatprep.subr.bf16.mxu1 %v535_v0 }
 0x12c   :  { %425 = vmatpush3.bf16.msra.mxu1 %v292_v50 }
 0x1f6   :  { %v176_v32 = vpop.f32.mrb[0].mxu1 }
 0x1f7   :  { %v177_v33 = vadd.f32 %v176_v32, %v126_v31  ;;  %v412_v34 = vpop.f32.mrb[1].mxu1 }
 0x1f8   :  { %v179_v35 = vpop.f32.mrb[2].mxu1 }
 0x1f9   :  { %v182_v36 = vmul.f32 %v177_v33, %v177_v33  ;;  %v413_v37 = vpop.f32.mrb[3].mxu1 }
 0x1fb   :  { %v183_v38 = vmul.f32 %v182_v36, %v177_v33 }
 0x1fd   :  { %v184_v39 = vmul.f32 0.044715, %v183_v38 }
 0x1ff   :  { %v185_v40 = vadd.f32 %v184_v39, %v177_v33 }
 0x201   :  { %v186_v41 = vmul.f32 0.7978846, %v185_v40 }
 0x203   :  { %447 = vtanh.f32 %v186_v41 }
 0x20d   :  { %v448_v42 = vpop.eup %447 }
 0x20e   :  { %v188_v43 = vadd.f32 1.0, %v448_v42 }
 0x210   :  { %v189_v44 = vmul.f32 0.5, %v188_v43 }
 0x212   :  { %v190_v45 = vmul.f32 %v189_v44, %v177_v33 }
 0x214   :  { %v191_v46 = vpack.c.bf16 %v190_v45, %v190_v45 }
 0x216   :  { %417 = vmatmul.mubr.msk.bf16.vlgmr.msra.gmra.mrb[4].mxu0 %vm206_vm2, %v191_v46 }
 0x2e9   :  { %v244_v54 = vpop.f32.mrb[4].mxu0 }
 0x2ea   :  { %v245_v55 = vadd.f32 %v244_v54, %v199_v53  ;;  %v418_v56 = vpop.f32.mrb[5].mxu0 }
 0x2eb   :  { %v247_v57 = vpop.f32.mrb[6].mxu0 }
 0x2ec   :  { %v250_v58 = vmul.f32 %v245_v55, %v245_v55  ;;  %v419_v59 = vpop.f32.mrb[7].mxu0 }
 0x2ee   :  { %v251_v60 = vmul.f32 %v250_v58, %v245_v55 }
 0x2f0   :  { %v252_v61 = vmul.f32 0.044715, %v251_v60 }
 0x2f2   :  { %v253_v62 = vadd.f32 %v252_v61, %v245_v55 }
 0x2f4   :  { %v254_v63 = vmul.f32 0.7978846, %v253_v62 }
 0x2f6   :  { %449 = vtanh.f32 %v254_v63 }
 0x300   :  { %v450_v0 = vpop.eup %449 }
 0x301   :  { %v256_v1 = vadd.f32 1.0, %v450_v0 }
 0x303   :  { %v257_v2 = vmul.f32 0.5, %v256_v1 }
 0x305   :  { %v258_v3 = vmul.f32 %v257_v2, %v245_v55 }
 0x307   :  { %v259_v4 = vpack.c.bf16 %v258_v3, %v258_v3 }
 0x309   :  { %427 = vmatmul.mubr.msk.bf16.vlgmr.msra.gmra.mrb[4].mxu1 %vm286_vm4, %v259_v4 }
 0x3dc   :  { %v328_v8 = vpop.f32.mrb[4].mxu1 }
 0x3dd   :  { %v329_v9 = vadd.f32 %v328_v8, %v270_v7  ;;  %v428_v10 = vpop.f32.mrb[5].mxu1 }
 0x3de   :  { %v331_v12 = vpop.f32.mrb[6].mxu1 }
 0x3df   :  { %v385_v13 = vmul.f32 -1.442695, %v329_v9  ;;  %v429_v14 = vpop.f32.mrb[7].mxu1 }
 0x3e1   :  { %451 = vpow2.f32 %v385_v13 }
 0x3eb   :  { %v452_v15 = vpop.eup %451 }
 0x3ec   :  { %v337_v16 = vadd.f32 1.0, %v452_v15 }
 0x3ee   :  { %453 = vrcp.f32 %v337_v16 }
 0x3f8   :  { %v454_v17 = vpop.eup %453 }
 0x3f9   :  { %v341_v18 = vsel %vm340_vm5, %v454_v17, -inf }
 0x3fa   :  { %342 = vmax.xlane.f32.xlu0 %v341_v18 }
 0x487   :  { %v343_v19 = vpop.xlane.xlu0 %342 }
 0x488   :  { %v344_v20 = vsub.f32 %v454_v17, %v343_v19 }
 0x48a   :  { %v345_v21 = vmul.f32 1.442695, %v344_v20 }
 0x48c   :  { %455 = vpow2.f32 %v345_v21 }
 0x496   :  { %v456_v11 = vpop.eup %455 }
 0x497   :  { %v347_v22 = vsel %vm340_vm5, %v456_v11, 0.0 }
 0x498   :  { %348 = vadd.xlane.f32.xlu0 %v347_v22 }
 0x525   :  { %v349_v23 = vpop.xlane.xlu0 %348 }
 0x526   :  { %457 = vrcp.f32 %v349_v23 }
 0x530   :  { %v458_v24 = vpop.eup %457 }
 0x531   :  { %v351_v25 = vmul.f32 %v458_v24, %v456_v11 }
 0x533   :  { %v352_v26 = vsel %vm340_vm5, %v351_v25, %v454_v17 }
 0x534   :  { %v354_v27 = vsel %vm353_vm6, %v352_v26, 0.0 }
 0x535   :  { %356 = vst.msk [vmem:[#allocation7] sm:$0xff] %vm355_vm7, %v354_v27 }
 0x536   :  { %514 = shalt.err (!%p511_p6)
}
 0x537   :  { %s515_s10 = scalar_lea.hbm %s625_s2, 128 }
 0x538   :  { %p516_p7 = scmp.ne.s32.totalorder %s625_s2, %s515_s10  ;;  %p519_p8 = scmp.lt.u32.totalorder %s515_s10, %s625_s2 }
 0x53a   :  { %p521_p9 = pnand %p519_p8, %p516_p7 }
 0x53c   :  { %524 = shalt.err (!%p521_p9)
}
 0x53d   :  { %366 = dma.vmem_to_hbm [thread:$0]  %s364_s6, 128, %s625_s2, [#allocation4]  }
 0x53e   :  { %529 = dma.done.wait [#allocation4], 128  }
 0x53f   :  { %530 = vsyncadd [#allocation4], 4294967168 }
 0x540   :  { %370 = vsyncpa [#allocation3], 1 }
 0x541   :  { %371 = vsyncpa [#allocation6], 1 }
 0x542   :  { %372 = vsyncpa [#allocation4], 1 }

</bundles_post_ra>
